<compile_context>
chip_gen: v7x
topology: tpu7x:2x2x1
jax: 0.10.0
libtpu: 0.0.40
codegen_flags: <defaults>
</compile_context>

<pallas_src>
import math
import functools
import numpy as np

import jax
import jax.numpy as jnp
from jax import lax
from jax.experimental import pallas as pl
from jax.experimental.pallas import tpu as pltpu


# ---------------- kernel A: sampled-score sparsity measure M ----------------
def _sparsity_kernel(cnt_ref, q_ref, k_ref, m_ref, *, inv_LK):
    # cnt_ref: (L_K, TQ) bf16 precomputed sample counts (shared across B, H)
    # q_ref:   (1, 1, TQ, D); k_ref: (1, 1, L_K, D); m_ref: (1, 1, 1, TQ)
    q = q_ref[0, 0]                                   # (TQ, D)
    k = k_ref[0, 0]                                   # (L_K, D)
    # Transposed score tile (keys-major) so the key reductions produce lane-dense
    # (1, TQ) rows and the output store is a single unmasked vst.
    scores_t = lax.dot_general(k, q, (((1,), (1,)), ((), ())),
                               preferred_element_type=jnp.float32)    # (L_K, TQ)
    cnt_t = cnt_ref[...]                              # (L_K, TQ) bf16
    sampled_max = jnp.max(jnp.where(cnt_t > 0, scores_t, -jnp.inf),
                          axis=0, keepdims=True)      # (1, TQ)
    # cnt weights the sum so duplicate samples are counted, matching the reference.
    sampled_sum = jnp.sum(cnt_t.astype(jnp.float32) * scores_t,
                          axis=0, keepdims=True)      # (1, TQ)
    m_ref[0, 0] = (sampled_max - sampled_sum * inv_LK).astype(m_ref.dtype)


# ------- fused kernel: cumsum context + ProbMask softmax attn + MXU blend-scatter -------
def _context_kernel(qr_ref, k_ref, v_ref, qpos_ref, tril_ref, out_ref, *, scale, n_top):
    v = v_ref[0, 0]                                   # (L_V, D)

    # ---- initial context: causal cumulative sum of V as one MXU matmul vs tril ones ----
    ctx = lax.dot_general(tril_ref[...], v, (((1,), (0,)), ((), ())),
                          preferred_element_type=jnp.float32)          # (L_Q, D)
    L_Q = ctx.shape[0]

    # ---- top-n_top query attention with ProbMask causal masking ----
    qr = qr_ref[0, 0]                                 # (n_top, D)
    k = k_ref[0, 0]                                   # (L_K, D)
    scores = lax.dot_general(qr, k, (((1,), (1,)), ((), ())),
                             preferred_element_type=jnp.float32) * scale   # (n_top, L_K)
    qpos = qpos_ref[0, 0]                             # (n_top, 1) int32 original positions
    kpos = lax.broadcasted_iota(jnp.int32, scores.shape, 1)
    scores = jnp.where(kpos > qpos, -jnp.inf, scores)
    smax = jnp.max(scores, axis=-1, keepdims=True)
    e = jnp.exp(scores - smax)
    denom = jnp.sum(e, axis=-1, keepdims=True)
    attn = e * pl.reciprocal(denom, approx=True)      # EUP reciprocal, frees VALU slots
    upd = lax.dot_general(attn.astype(v.dtype), v, (((1,), (0,)), ((), ())),
                          preferred_element_type=jnp.float32)              # (n_top, D)

    # ---- blend-scatter on the MXU: one dense store, no dynamic 1-row writes ----
    lq_iota = lax.broadcasted_iota(jnp.int32, (n_top, L_Q), 1)
    one_hot = (lq_iota == qpos).astype(jnp.float32)                        # (n_top, L_Q)
    scattered = lax.dot_general(one_hot, upd, (((0,), (0,)), ((), ())),
                                preferred_element_type=jnp.float32)        # (L_Q, D)
    row_cnt = lax.dot_general(one_hot, jnp.ones((n_top, 1), jnp.float32),
                              (((0,), (0,)), ((), ())),
                              preferred_element_type=jnp.float32)          # (L_Q, 1)
    out_ref[0, 0] = jnp.where(row_cnt > 0.0, scattered, ctx).astype(out_ref.dtype)


# ---------------- wrapper ----------------
def prob_attention(queries, keys, values, rng_key, factor=5, scale=None, mask_flag=True):
    B, L_Q, H, D = queries.shape
    _, L_K, _, _ = keys.shape
    # Keep the caller's dtype (no forced f32 upcast); matmuls accumulate in f32.
    Q = jnp.transpose(queries, (0, 2, 1, 3))          # (B, H, L_Q, D)
    K = jnp.transpose(keys, (0, 2, 1, 3))             # (B, H, L_K, D)
    V = jnp.transpose(values, (0, 2, 1, 3))           # (B, H, L_V, D)
    L_V = V.shape[2]

    U_part = min(factor * int(np.ceil(np.log(L_K))), L_K)   # sample_k
    u = min(factor * int(np.ceil(np.log(L_Q))), L_Q)        # n_top

    assert mask_flag and L_Q == L_V
    # TODO(synk): mask_flag=False mean-initialization / cross-attention branch not implemented.

    index_sample = jax.random.randint(rng_key, (L_Q, U_part), 0, L_K, dtype=jnp.int32)
    # Precompute the sample-count mask once (identical for every (b, h)); store it
    # transposed (keys x queries) and in bf16 so it is small and lane-dense in VMEM.
    cnt = jnp.zeros((L_Q, L_K), jnp.float32).at[
        jnp.arange(L_Q)[:, None], index_sample].add(1.0)
    cnt_t = cnt.T.astype(jnp.bfloat16)                # (L_K, L_Q)

    # Tile L_Q so the per-step (L_K, TQ) f32 score tile fits v7x's 64 MiB physical VMEM.
    TQ = L_Q if L_Q <= 1024 else 512
    n_q = pl.cdiv(L_Q, TQ)

    # 48 MiB vmem limit is safe on v7x (64 MiB physical); v6e/v5e can raise it.
    cparams_a = pltpu.CompilerParams(
        dimension_semantics=("parallel", "parallel", "parallel"),
        vmem_limit_bytes=48 * 1024 * 1024,
    )
    cparams_ctx = pltpu.CompilerParams(
        dimension_semantics=("parallel", "parallel"),
        vmem_limit_bytes=48 * 1024 * 1024,
    )

    # kernel A: sparsity measure M = max(QK_sample) - sum(QK_sample) / L_K, lane-dense.
    # q is the outermost grid axis so cnt_t is fetched only n_q times total.
    M = pl.pallas_call(
        functools.partial(_sparsity_kernel, inv_LK=1.0 / L_K),
        out_shape=jax.ShapeDtypeStruct((B, H, 1, L_Q), jnp.float32),
        grid_spec=pltpu.PrefetchScalarGridSpec(
            num_scalar_prefetch=0,
            grid=(n_q, B, H),
            in_specs=[
                pl.BlockSpec((L_K, TQ), lambda q, b, h: (0, q)),          # cnt_t (resident per q)
                pl.BlockSpec((1, 1, TQ, D), lambda q, b, h: (b, h, q, 0)),  # Q
                pl.BlockSpec((1, 1, L_K, D), lambda q, b, h: (b, h, 0, 0)),  # K
            ],
            out_specs=pl.BlockSpec((1, 1, 1, TQ), lambda q, b, h: (b, h, 0, q)),
        ),
        compiler_params=cparams_a,
    )(cnt_t, Q, K)[:, :, 0, :]                        # (B, H, L_Q)

    # glue: top-u query selection + gather of reduced queries (no clean Pallas top-k)
    index = lax.top_k(M, u)[1].astype(jnp.int32)      # (B, H, u)
    Q_reduce = jnp.take_along_axis(Q, index[..., None], axis=2)   # (B, H, u, D)

    scl = scale if scale is not None else 1.0 / math.sqrt(D)

    # lower-triangular ones matrix for the causal cumsum matmul (DMA'd once, resident)
    tril = jnp.tril(jnp.ones((L_Q, L_V), V.dtype))
    qpos = index[..., None]                           # (B, H, u, 1) int32

    # fused kernel: cumsum initial context + masked softmax attention + MXU blend-scatter
    context = pl.pallas_call(
        functools.partial(_context_kernel, scale=scl, n_top=u),
        out_shape=jax.ShapeDtypeStruct((B, H, L_Q, D), V.dtype),
        grid_spec=pltpu.PrefetchScalarGridSpec(
            num_scalar_prefetch=0,
            grid=(B, H),
            in_specs=[
                pl.BlockSpec((1, 1, u, D), lambda b, h: (b, h, 0, 0)),     # Q_reduce
                pl.BlockSpec((1, 1, L_K, D), lambda b, h: (b, h, 0, 0)),   # K
                pl.BlockSpec((1, 1, L_V, D), lambda b, h: (b, h, 0, 0)),   # V
                pl.BlockSpec((1, 1, u, 1), lambda b, h: (b, h, 0, 0)),     # query positions
                pl.BlockSpec((L_Q, L_V), lambda b, h: (0, 0)),             # tril ones (resident)
            ],
            out_specs=pl.BlockSpec((1, 1, L_Q, D), lambda b, h: (b, h, 0, 0)),
        ),
        compiler_params=cparams_ctx,
    )(Q_reduce, K, V, qpos, tril)

    return context, None   # output_attention=False -> attn is None


if __name__ == "__main__":
    key = jax.random.PRNGKey(0)
    kq, kk, kv, ks = jax.random.split(key, 4)
    B, L, H, D = 2, 24, 4, 32
    queries = jax.random.normal(kq, (B, L, H, D), jnp.float32)
    keys = jax.random.normal(kk, (B, L, H, D), jnp.float32)
    values = jax.random.normal(kv, (B, L, H, D), jnp.float32)

    context, attn = prob_attention(queries, keys, values, ks)
    context = jax.block_until_ready(context)

    assert context.shape == (B, H, L, D)
    assert bool(jnp.all(jnp.isfinite(context)))
    print("KERNEL_OK")
</pallas_src>

<mosaic_0001>
module attributes {stable_mosaic.version = 11 : i64} {
  func.func @_sparsity_kernel(%arg0: i32, %arg1: i32, %arg2: i32, %arg3: memref<24x24xbf16, #tpu.memory_space<vmem>>, %arg4: memref<1x1x24x32xf32, #tpu.memory_space<vmem>>, %arg5: memref<1x1x24x32xf32, #tpu.memory_space<vmem>>, %arg6: memref<1x1x1x24xf32, #tpu.memory_space<vmem>>) attributes {dimension_semantics = [#tpu.dimension_semantics<parallel>, #tpu.dimension_semantics<parallel>, #tpu.dimension_semantics<parallel>], iteration_bounds = array<i64: 1, 2, 4>, scalar_prefetch = 0 : i64, scratch_operands = 0 : i64, tpu.core_type = #tpu.core_type<tc>, window_params = [{transform_indices = @transform_0, window_bounds = array<i64: 24, 24>}, {transform_indices = @transform_1, window_bounds = array<i64: 1, 1, 24, 32>}, {transform_indices = @transform_2, window_bounds = array<i64: 1, 1, 24, 32>}, {transform_indices = @transform_3, window_bounds = array<i64: 1, 1, 1, 24>}]} {
    %c0 = arith.constant 0 : index
    %c0_0 = arith.constant 0 : index
    %c0_1 = arith.constant 0 : index
    %c0_2 = arith.constant 0 : index
    %0 = vector.load %arg4[%c0, %c0_0, %c0_1, %c0_2] : memref<1x1x24x32xf32, #tpu.memory_space<vmem>>, vector<1x1x24x32xf32>
    %1 = vector.shape_cast %0 : vector<1x1x24x32xf32> to vector<24x32xf32>
    %c0_3 = arith.constant 0 : index
    %c0_4 = arith.constant 0 : index
    %c0_5 = arith.constant 0 : index
    %c0_6 = arith.constant 0 : index
    %2 = vector.load %arg5[%c0_3, %c0_4, %c0_5, %c0_6] : memref<1x1x24x32xf32, #tpu.memory_space<vmem>>, vector<1x1x24x32xf32>
    %3 = vector.shape_cast %2 : vector<1x1x24x32xf32> to vector<24x32xf32>
    %cst = arith.constant dense<0.000000e+00> : vector<24x24xf32>
    %4 = tpu.matmul %3, %1, %cst {dimension_numbers = #tpu.dot_dimension_numbers<[1], [1], [0], [0], [0, 0, 1, 0], [], []>} : vector<24x32xf32>, vector<24x32xf32>, vector<24x24xf32> -> vector<24x24xf32>
    %c0_7 = arith.constant 0 : index
    %c0_8 = arith.constant 0 : index
    %5 = vector.load %arg3[%c0_7, %c0_8] : memref<24x24xbf16, #tpu.memory_space<vmem>>, vector<24x24xbf16>
    %cst_9 = arith.constant 0.000000e+00 : bf16
    %6 = vector.broadcast %cst_9 : bf16 to vector<24x24xbf16>
    %7 = arith.cmpf ogt, %5, %6 : vector<24x24xbf16>
    %cst_10 = arith.constant 0xFF800000 : f32
    %8 = vector.broadcast %cst_10 : f32 to vector<24x24xf32>
    %9 = arith.select %7, %4, %8 : vector<24x24xi1>, vector<24x24xf32>
    %cst_11 = arith.constant dense<0xFF800000> : vector<24xf32>
    %10 = vector.multi_reduction <maximumf>, %9, %cst_11 [0] : vector<24x24xf32> to vector<24xf32>
    %11 = vector.shape_cast %10 : vector<24xf32> to vector<1x24xf32>
    %12 = arith.extf %5 : vector<24x24xbf16> to vector<24x24xf32>
    %13 = arith.mulf %12, %4 : vector<24x24xf32>
    %cst_12 = arith.constant dense<0.000000e+00> : vector<24xf32>
    %14 = vector.multi_reduction <add>, %13, %cst_12 [0] : vector<24x24xf32> to vector<24xf32>
    %15 = vector.shape_cast %14 : vector<24xf32> to vector<1x24xf32>
    %cst_13 = arith.constant 0.0416666679 : f32
    %16 = vector.broadcast %cst_13 : f32 to vector<1x24xf32>
    %17 = arith.mulf %15, %16 : vector<1x24xf32>
    %18 = arith.subf %11, %17 : vector<1x24xf32>
    %c0_14 = arith.constant 0 : index
    %c0_15 = arith.constant 0 : index
    %c0_16 = arith.constant 0 : index
    %c0_17 = arith.constant 0 : index
    %19 = vector.load %arg6[%c0_14, %c0_15, %c0_16, %c0_17] : memref<1x1x1x24xf32, #tpu.memory_space<vmem>>, vector<1x1x1x24xf32>
    %20 = vector.shape_cast %19 : vector<1x1x1x24xf32> to vector<1x24xf32>
    %21 = vector.shape_cast %18 : vector<1x24xf32> to vector<1x1x1x24xf32>
    tpu.vector_store %arg6[%c0_14, %c0_15, %c0_16, %c0_17], %21 {strides = array<i32>} : memref<1x1x1x24xf32, #tpu.memory_space<vmem>>, vector<1x1x1x24xf32>,
    return
  }
  func.func @transform_0(%arg0: i32, %arg1: i32, %arg2: i32) -> (i32, i32) {
    %c0_i32 = arith.constant 0 : i32
    %c0_i32_0 = arith.constant 0 : i32
    return %c0_i32, %arg0 : i32, i32
  }
  func.func @transform_1(%arg0: i32, %arg1: i32, %arg2: i32) -> (i32, i32, i32, i32) {
    %c0_i32 = arith.constant 0 : i32
    %c0_i32_0 = arith.constant 0 : i32
    return %arg1, %arg2, %arg0, %c0_i32 : i32, i32, i32, i32
  }
  func.func @transform_2(%arg0: i32, %arg1: i32, %arg2: i32) -> (i32, i32, i32, i32) {
    %c0_i32 = arith.constant 0 : i32
    %c0_i32_0 = arith.constant 0 : i32
    %c0_i32_1 = arith.constant 0 : i32
    return %arg1, %arg2, %c0_i32, %c0_i32_0 : i32, i32, i32, i32
  }
  func.func @transform_3(%arg0: i32, %arg1: i32, %arg2: i32) -> (i32, i32, i32, i32) {
    %c0_i32 = arith.constant 0 : i32
    %c0_i32_0 = arith.constant 0 : i32
    return %arg1, %arg2, %c0_i32, %arg0 : i32, i32, i32, i32
  }
}

</mosaic_0001>

<bundles_post_ra>
// kernel: tpu_custom_call.1
= control target key start
LH: loop header
LB: loop body
LE: loop exit
PB: predicated region body
PF: predicated region fallthrough
CT: control target
= control target key end

     0   :  { %s1278_s0 = inlined_call_operand.hbm [shape: bf16[24,24], index: 0, kind: input, shape index: {}]   ;;  %s1279_s1 = inlined_call_operand.hbm [shape: f32[2,4,24,32], index: 1, kind: input, shape index: {}]   ;;  %s1280_s2 = inlined_call_operand.hbm [shape: f32[2,4,24,32], index: 2, kind: input, shape index: {}]   ;;  %s1281_s3 = inlined_call_operand.hbm [shape: f32[2,4,1,24], index: 3, kind: output, shape index: {}]  }
   0x1   :  { %1295 = sst [smem:[#allocation17_spill]] %s1279_s1 }
   0x2   :  { %8 = vsyncpa [#allocation3], 0 }
   0x3   :  { %9 = vsyncpa [#allocation6], 0 }
   0x4   :  { %11 = vsyncpa [#allocation6 + $0x1], 0 }
   0x5   :  { %12 = vsyncpa [#allocation4], 0 }
   0x6   :  { %14 = vsyncpa [#allocation4 + $0x1], 0  ;;  %s964_s12 = smov 0   ;;  %s966_s13 = smov 0  }
   0x7   :  { %s968_s14 = smov 0   ;;  %s970_s15 = smov 0  }
   0x8   :  { %s972_s16 = smov 0   ;;  %s974_s17 = smov 0  }
   0x9   :  { %s976_s18 = smov 0   ;;  %s978_s19 = smov 0  }
   0xa LB: > { %1296 = sst [smem:[#allocation12_spill]] %s922_s17  ;;  %s32_s20 = sadd.s32 1, %s922_s17  ;;  %s930_s19 = sphi %s978_s19, %s20_s19   ;;  %s926_s18 = sphi %s976_s18, %s1324_s18   ;;  %s922_s17 = sphi %s974_s17, %s1323_s17   ;;  %s918_s16 = sphi %s972_s16, %s1322_s16   ;;  %s914_s15 = sphi %s970_s15, %s1321_s15   ;;  %s910_s14 = sphi %s968_s14, %s1327_s14   ;;  %s906_s13 = sphi %s966_s13, %s1326_s13   ;;  %s902_s12 = sphi %s964_s12, %s1325_s12  }
   0xb   : > { %1297 = sst [smem:[#allocation13_spill]] %s926_s18  ;;  %s35_s21 = sadd.s32 1, %s926_s18 }
   0xc   : > { %p33_p0 = scmp.ge.s32.totalorder %s32_s20, 4  ;;  %s76_s22 = sadd.s32 1, %s910_s14 }
   0xd   : > { %p83_p1 = scmp.ne.s32.totalorder %s910_s14, %s906_s13  ;;  %p84_p2 = scmp.eq.s32.totalorder %s930_s19, 0 }
   0xe   : > { %s1329_s20 = smov (%p33_p0, %s32_s20), 0  ;;  %s1331_s21 = smov (!%p33_p0, %s35_s21), %s926_s18 }
   0xf   : > { %1298 = sst [smem:[#allocation14_spill]] %s1329_s20  ;;  %s70_s23 = ssub.s32 %s922_s17, %s1329_s20 }
  0x10   : > { %p1018_p3 = por %p84_p2, %p83_p1  ;;  %p37_p4 = scmp.ge.s32.totalorder %s1331_s21, 2 }
  0x11   : > { %p664_p5 = scmp.lt.s32.totalorder %s930_s19, 8  ;;  %s186_s25 = sand.u32 1, %s930_s19  }
  0x12   : > { %s1333_s21 = smov (%p37_p4, %s1331_s21), 0  ;;  %s188_s26 = sand.u32 1, %s910_s14  }
  0x13   : > { %1300 = sst [smem:[#allocation15_spill]] %s1333_s21  ;;  %s69_s27 = ssub.s32 %s926_s18, %s1333_s21 }
  0x14   : > { %s1029_s28 = smul.u32 24, %s188_s26  ;;  %s71_s29 = sor.u32 %s70_s23, %s69_s27 }
  0x15   : > { %s632_s30 = smul.u32 3, %s922_s17  ;;  %p74_p6 = scmp.eq.s32.totalorder %s71_s29, 0 }
  0x16   : > { %s633_s4 = smul.u32 12, %s926_s18  ;;  %s190_s5 = scalar_lea.vmem [#allocation5], %s1029_s28 }
  0x17   : > { %s201_s6 = sshll.u32 %s190_s5, 4  ;;  %p1046_p7 = pnand %p664_p5, %p1018_p3  ;;  %s1039_s6 = int_to_ptr.vmem [resolvable:$true] %s201_s6 }
  0x18   : > { %s1035_s7 = scalar_select %p74_p6, %s910_s14, %s76_s22  }
  0x19   : > { %s1037_s8 = sadd.s32 %s633_s4, %s632_s30  ;;  %s1303_s1 = sld [smem:[#allocation17_spill]] }
  0x1a   : > { %1301 = sst [smem:[#allocation16_spill]] %s1035_s7  ;;  %s588_s9 = sshll.u32 %s1037_s8, 7 }
  0x1b   : > { %s1302_s10 = scalar_select %p1046_p7, 1, 0 }
  0x1c   : > { %s1057_s26 = scalar_lea.sflag [#allocation6], %s186_s25  ;;  %p1289_p9 = pneg %p1046_p7 }
  0x1f   : > { %s1055_s22 = scalar_lea.hbm %s1303_s1, %s588_s9  ;;  %s745_s30 = scalar_lea.hbm %s1303_s1, 3072 }
  0x20   : > { %s740_s24 = scalar_lea.hbm %s1055_s22, 384  ;;  %p746_p12 = scmp.lt.u32.totalorder %s1055_s22, %s1303_s1 }
  0x21   : > { %p741_p8 = scmp.ne.s32.totalorder %s1055_s22, %s740_s24  ;;  %p747_p13 = scmp.lt.u32.totalorder %s745_s30, %s740_s24 }
  0x22   : > { %p749_p2 = scmp.lt.u32.totalorder %s740_s24, %s1055_s22 }
  0x23   : > { %p743_p10 = pnand %p1289_p9, %p741_p8  ;;  %p748_p0 = por %p747_p13, %p746_p12 }
  0x25   : > { %p744_p11 = pneg %p743_p10  ;;  %p750_p3 = por %p749_p2, %p748_p0 }
  0x27   : > { %p751_p4 = pnand %p750_p3, %p744_p11 }
  0x29   : > { %754 = shalt.err (!%p751_p4)
}
  0x2a   : > { %s755_s25 = scalar_lea.vmem %s1039_s6, 384  ;;  %s932_s11 = smov [#allocation5]  }
  0x2b   : > { %p756_p5 = scmp.ne.s32.totalorder %s1039_s6, %s755_s25  ;;  %s760_s23 = sshll.u32 %s932_s11, 4  ;;  %s761_s23 = int_to_ptr.vmem [resolvable:$false] %s760_s23 }
  0x2c   : > { %s762_s27 = scalar_lea.vmem %s761_s23, 768  ;;  %p763_p10 = scmp.lt.s32.totalorder %s1039_s6, %s761_s23 }
  0x2d   : > { %p758_p6 = pnand %p756_p5, %p1289_p9  ;;  %p764_p12 = scmp.lt.s32.totalorder %s762_s27, %s755_s25 }
  0x2f   : > { %p759_p8 = pneg %p758_p6  ;;  %p765_p13 = por %p764_p12, %p763_p10 }
  0x31   : > { %p766_p0 = pnand %p765_p13, %p759_p8 }
  0x33   : > { %769 = shalt.err (!%p766_p0)
}
  0x34   : > { %s1282_s24 = smov 128   ;;  %s1283_s29 = smov 8  }
  0x35   : > { %655 = dma.hbm_to_vmem [thread:$0]  (!%p1046_p7), %s1055_s22, 384, %s1039_s6, %s1057_s26, %s1282_s24, %s1282_s24, %s1283_s29  }
  0x36   : > { %s1089_s30 = sadd.s32 4294967295, %s930_s19   ;;  %s584_s4 = sadd.s32 4294967294, %s930_s19  }
  0x37   : > { %p89_p11 = scmp.ne.s32.totalorder %s906_s13, %s902_s12  ;;  %p1288_p2 = scmp.eq.s32.totalorder %s1089_s30, 0 }
  0x38   : > { %p145_p3 = scmp.eq.s32.totalorder %s1089_s30, 7  ;;  %p151_p4 = scmp.eq.s32.totalorder %s584_s4, 7 }
  0x39   : > { %p585_p5 = scmp.ge.s32.totalorder %s930_s19, 1  ;;  %p1099_p6 = por %p1288_p2, %p89_p11 }
  0x3a   : > { %p1106_p8 = por %p145_p3, %p83_p1  ;;  %p1110_p10 = por %p151_p4, %p89_p11 }
  0x3b   : > { %s1304_s5 = scalar_select %p1099_p6, 1, 0 }
  0x3c   : > { %s1305_s6 = scalar_select %p1106_p8, 1, 0 }
  0x3d   : > { %s1306_s22 = scalar_select %p1110_p10, 1, 0 }
  0x3e   : > { %p158_p12 = scmp.lt.s32.totalorder %s930_s19, 9  ;;  %s935_s11 = smov [#allocation2]  }
  0x3f   : > { %s172_s23 = sshll.u32 %s935_s11, 4  ;;  %s215_s4 = scalar_lea.vmem [#allocation7], %s1029_s28  ;;  %s1119_s23 = int_to_ptr.vmem [resolvable:$true] %s172_s23 }
  0x40   : > { %p1115_p13 = pnand %p585_p5, %p158_p12  ;;  %s224_s24 = sshll.u32 %s215_s4, 4  ;;  %s1137_s24 = int_to_ptr.vmem [resolvable:$true] %s224_s24 }
  0x41   : > { %s1135_s21 = scalar_lea.hbm %s1280_s2, %s588_s9  ;;  %s770_s18 = scalar_lea.hbm %s1278_s0, 192 }
  0x42   : > { %s1307_s25 = scalar_select %p1115_p13, 1, 0 }
  0x43   : > { %p648_p0 = pneg %p1115_p13  ;;  %p771_p11 = scmp.ne.s32.totalorder %s1278_s0, %s770_s18 }
  0x44   : > { %p777_p12 = scmp.lt.u32.totalorder %s770_s18, %s1278_s0 }
  0x45   : > { %p1125_p1 = pnand %p648_p0, %p1288_p2 }
  0x47   : > { %p772_p3 = pneg %p1125_p1 }
  0x49   : > { %p773_p4 = pnand %p772_p3, %p771_p11 }
  0x4b   : > { %p774_p5 = pneg %p773_p4 }
  0x4d   : > { %p779_p0 = pnand %p777_p12, %p774_p5 }
  0x4f   : > { %782 = shalt.err (!%p779_p0)
}
  0x50   : > { %s783_s1 = scalar_lea.vmem %s1119_s23, 192  ;;  %p791_p8 = scmp.lt.s32.totalorder %s1119_s23, %s1119_s23 }
  0x51   : > { %p784_p2 = scmp.ne.s32.totalorder %s1119_s23, %s783_s1  ;;  %p792_p6 = scmp.lt.s32.totalorder %s783_s1, %s783_s1 }
  0x53   : > { %p786_p9 = pnand %p784_p2, %p772_p3  ;;  %p793_p13 = por %p792_p6, %p791_p8 }
  0x55   : > { %p787_p10 = pneg %p786_p9 }
  0x57   : > { %p794_p7 = pnand %p793_p13, %p787_p10 }
  0x59   : > { %797 = shalt.err (!%p794_p7)
}
  0x5a   : > { %s936_s17 = smov 64   ;;  %s937_s18 = smov 4  }
  0x5b   : > { %651 = dma.hbm_to_vmem [thread:$0]  (!%p1125_p1), %s1278_s0, 192, %s1119_s23, [#allocation3], %s936_s17, %s936_s17, %s937_s18  }
  0x5c   : > { %s798_s9 = scalar_lea.hbm %s1135_s21, 384  ;;  %p1309_p2 = scmp.ne.s32.totalorder %s1302_s10, 0 }
  0x5d   : > { %p799_p9 = scmp.ne.s32.totalorder %s1135_s21, %s798_s9  ;;  %s803_s11 = scalar_lea.hbm %s1280_s2, 3072 }
  0x5e   : > { %p1310_p6 = pneg %p1309_p2  ;;  %p804_p10 = scmp.lt.u32.totalorder %s1135_s21, %s1280_s2 }
  0x5f   : > { %p805_p13 = scmp.lt.u32.totalorder %s803_s11, %s798_s9  ;;  %p807_p3 = scmp.lt.u32.totalorder %s798_s9, %s1135_s21 }
  0x60   : > { %p801_p8 = pnand %p799_p9, %p1310_p6 }
  0x61   : > { %p806_p11 = por %p805_p13, %p804_p10 }
  0x62   : > { %p802_p7 = pneg %p801_p8 }
  0x63   : > { %p808_p4 = por %p807_p3, %p806_p11 }
  0x65   : > { %p809_p5 = pnand %p808_p4, %p802_p7 }
  0x67   : > { %812 = shalt.err (!%p809_p5)
}
  0x68   : > { %s813_s23 = scalar_lea.vmem %s1137_s24, 384  ;;  %p1311_p12 = pmov %p1310_p6 }
  0x69   : > { %p814_p1 = scmp.ne.s32.totalorder %s1137_s24, %s813_s23  ;;  %s938_s27 = smov [#allocation7]  }
  0x6a   : > { %s818_s1 = sshll.u32 %s938_s27, 4  ;;  %s819_s1 = int_to_ptr.vmem [resolvable:$false] %s818_s1 }
  0x6b   : > { %p816_p0 = pnand %p814_p1, %p1311_p12  ;;  %s820_s17 = scalar_lea.vmem %s819_s1, 768 }
  0x6c   : > { %p821_p6 = scmp.lt.s32.totalorder %s1137_s24, %s819_s1  ;;  %p822_p8 = scmp.lt.s32.totalorder %s820_s17, %s813_s23 }
  0x6d   : > { %p817_p9 = pneg %p816_p0 }
  0x6e   : > { %p823_p10 = por %p822_p8, %p821_p6 }
  0x70   : > { %p824_p13 = pnand %p823_p10, %p817_p9 }
  0x72   : > { %827 = shalt.err (!%p824_p13)
}
  0x73   : > { %s1312_s18 = smov 8   ;;  %s1313_s20 = smov 128  }
  0x74   : > { %658 = dma.hbm_to_vmem [thread:$0]  (!%p1309_p2), %s1135_s21, 384, %s1137_s24, %s1057_s26, %s1313_s20, %s1313_s20, %s1312_s18  }
  0x75   : > { %p1314_p7 = scmp.ne.s32.totalorder %s1307_s25, 0 }
  0x76   : > { %p1315_p11 = scmp.eq.s32.totalorder (!%p1314_p7), %s1089_s30, 0 }
  0x77   : > { %236 = sbr.rel (%p1314_p7) target bundleno = 398 (0x18e), region = 32 }
  0x7e   : > { %889 = dma.done.wait (%p1315_p11), [#allocation3], 192   ;;  %p1316_p3 = pmov %p1315_p11 }
  0x7f   : > { %s242_s10 = sand.u32 1, %s1089_s30   ;;  %s1195_s7 = sand.u32 1, %s906_s13  }
  0x80   : > { %891 = vsyncadd (%p1316_p3), [#allocation3], 4294967104  ;;  %s637_s9 = smul.u32 24, %s1195_s7  ;;  %s243_s29 = scalar_lea.sflag [#allocation6], %s242_s10 }
  0x81   : > { %p1317_p2 = scmp.ne.s32.totalorder %s1304_s5, 0 }
  0x82   : > { %s246_s4 = scalar_lea.vmem [#allocation5], %s637_s9 }
  0x83   : > { %893 = dma.done.wait (%p1317_p2), %s243_s29, 768  }
  0x84   : > { %895 = vsyncadd (%p1317_p2), %s243_s29, 4294966528  ;;  %v939_v0 = vmov 0.0|0.0   ;;  %vm940_vm0 = vmmov 0   ;;  %v941_v1 = vmov 0.0   ;;  %vm292_vm1 = vcmask 261120   ;;  %v286_v2 = vld [vmem:[%s246_s4] sm:$0xff] }
  0x85   : > { %623 = vmatprep.subr.bf16.mxu0 %v939_v0  ;;  %627 = vmatprep.subr.bf16.mxu1 %v939_v0  ;;  %v287_v3 = vld [vmem:[%s246_s4 + $0x8] sm:$0xff]  ;;  %vm625_vm2 = vmpackc.low %vm292_vm1, %vm292_vm1  ;;  %v288_v5 = vld [vmem:[%s246_s4 + $0x10] sm:$0xff]  ;;  %s255_s21 = scalar_lea.vmem [#allocation7], %s637_s9  ;;  %v942_v12 = vmov 0   ;;  %vm409_vm8 = vcmask 195584   ;;  %s598_s26 = sshll.u32 %s918_s16, 2 }
  0x86   : > { %614 = vmatprep.mubr.msk.f32.mxu0 %vm940_vm0, %v941_v1  ;;  %617 = vmatprep.mubr.msk.f32.mxu1 %vm940_vm0, %v941_v1  ;;  %v624_v4 = vpack.c.bf16 %v287_v3, %v286_v2  ;;  %v289_v6 = vld [vmem:[%s255_s21] sm:$0xff]  ;;  %v290_v7 = vld [vmem:[%s255_s21 + $0x8] sm:$0xff]  ;;  %v291_v8 = vld [vmem:[%s255_s21 + $0x10] sm:$0xff]  ;;  %s454_s24 = sadd.s32 %s914_s15, %s598_s26  ;;  %s281_s5 = scalar_lea.vmem [#allocation8], %s1195_s7  ;;  %vm440_vm10 = vcmask 188416  }
  0x87   : > { %v391_v9 = vld [vmem:[#allocation2] sm:$0xf]  ;;  %v392_v10 = vld [vmem:[#allocation2 + $0x4] sm:$0xf]  ;;  %v393_v11 = vld [vmem:[#allocation2 + $0x8] sm:$0xf] }
  0x88   : > { %626 = vmatpush3.bf16.xpose.msk.msra.mxu0 %vm625_vm2, %v624_v4  ;;  %629 = vmatpush3.bf16.xpose.msk.msra.mxu1 %vm625_vm2, %v624_v4  ;;  %vm394_vm3 = vcmp.gt.bf16.partialorder %v391_v9, 0  ;;  %vm395_vm4 = vcmp.gt.bf16.partialorder %v392_v10, 0  ;;  %vm396_vm5 = vcmp.gt.bf16.partialorder %v393_v11, 0  ;;  %v421_v18 = vunpack.c.l.bf16 %v391_v9  ;;  %s599_s30 = sshll.u32 %s454_s24, 4  ;;  %s458_s25 = sshll.u32 %s281_s5, 4  ;;  %s1226_s25 = int_to_ptr.vmem [resolvable:$true] %s458_s25 }
  0x89   : > { %612 = vmatprep.subr.mxu0 %v941_v1  ;;  %628 = vmatprep.subr.mxu1 %v941_v1  ;;  %v397_v13 = vsel %vm394_vm3, 65537, %v942_v12  ;;  %v398_v14 = vsel %vm395_vm4, 65537, %v942_v12  ;;  %v399_v17 = vsel %vm396_vm5, 65537, %v942_v12  ;;  %v422_v19 = vunpack.c.l.bf16 %v392_v10  ;;  %s1224_s8 = scalar_lea.hbm %s1281_s3, %s599_s30  ;;  %s443_s15 = scalar_lea.sflag [#allocation4], %s1195_s7 }
  0x8a   : > { %v400_v15 = vunpack.c.l.b16 %v397_v13  ;;  %v401_v16 = vunpack.c.l.b16 %v398_v14  ;;  %v402_v20 = vunpack.c.l.b16 %v399_v17  ;;  %v423_v23 = vunpack.c.l.bf16 %v393_v11  ;;  %s828_s16 = scalar_lea.vmem %s1226_s25, 16  ;;  %p1318_p5 = scmp.ne.s32.totalorder %s1305_s6, 0 }
  0x8b   : > { %p829_p4 = scmp.ne.s32.totalorder %s1226_s25, %s828_s16  ;;  %s943_s23 = smov [#allocation8]  }
  0x8c   : > { %vm403_vm6 = vcmp.ne.s32.totalorder %v400_v15, 0  ;;  %vm404_vm7 = vcmp.ne.s32.totalorder %v401_v16, 0  ;;  %vm405_vm9 = vcmp.ne.s32.totalorder %v402_v20, 0  ;;  %s832_s27 = sshll.u32 %s943_s23, 4  ;;  %s833_s27 = int_to_ptr.vmem [resolvable:$false] %s832_s27 }
  0x8d   : > { %p830_p1 = pnand %p829_p4, %p1318_p5  ;;  %s834_s1 = scalar_lea.vmem %s833_s27, 32 }
  0x8e   : > { %p835_p0 = scmp.lt.s32.totalorder %s1226_s25, %s833_s27  ;;  %p836_p9 = scmp.lt.s32.totalorder %s834_s1, %s828_s16 }
  0x8f   : > { %p831_p12 = pneg %p830_p1 }
  0x90   : > { %613 = vmatpush3.xpose.msk.msra.mxu0 %vm292_vm1, %v288_v5  ;;  %630 = vmatpush3.xpose.msk.msra.mxu1 %vm292_vm1, %v288_v5  ;;  %p837_p6 = por %p836_p9, %p835_p0 }
  0x92   : > { %p838_p8 = pnand %p837_p6, %p831_p12 }
  0x93   : > { %615 = vmatmul.mubr.msk.f32.vlgmr.msra.gmra.mrb[0].mxu0 %vm292_vm1, %v289_v6  ;;  %618 = vmatmul.mubr.msk.f32.vlgmr.msra.gmra.mrb[0].mxu1 %vm292_vm1, %v290_v7 }
  0x94   : > { %620 = vmatprep.mubr.msk.f32.mxu1 %vm940_vm0, %v941_v1 }
  0x97   : > { %621 = vmatmul.mubr.msk.f32.gmra.mrb[2].mxu1 %vm292_vm1, %v291_v8 }
 0x166   : > { %v377_v21 = vpop.f32.mrb[0].mxu0  ;;  %v382_v22 = vpop.f32.mrb[0].mxu1 }
 0x167   : > { %v406_v24 = vsel %vm403_vm6, %v377_v21, -inf  ;;  %v424_v25 = vmul.f32 %v421_v18, %v377_v21  ;;  %v407_v26 = vsel %vm404_vm7, %v382_v22, -inf  ;;  %v425_v27 = vmul.f32 %v422_v19, %v382_v22  ;;  %v619_v28 = vpop.f32.mrb[1].mxu1  ;;  %v616_v29 = vpop.f32.mrb[1].mxu0 }
 0x168   : > { %v410_v30 = vsel %vm409_vm8, %v406_v24, -inf  ;;  %v411_v31 = vsel %vm409_vm8, %v407_v26, -inf }
 0x169   : > { %v427_v32 = vsel %vm409_vm8, %v424_v25, 0.0  ;;  %v413_v33 = vmax.f32 %v410_v30, %v411_v31  ;;  %v428_v34 = vsel %vm409_vm8, %v425_v27, 0.0 }
 0x16a   : > { %v429_v35 = vadd.f32 %v428_v34, %v427_v32  ;;  %v387_v36 = vpop.f32.mrb[2].mxu1 }
 0x16b   : > { %v408_v37 = vsel %vm405_vm9, %v387_v36, -inf  ;;  %v426_v38 = vmul.f32 %v423_v23, %v387_v36  ;;  %v622_v39 = vpop.f32.mrb[3].mxu1 }
 0x16c   : > { %v412_v40 = vsel %vm409_vm8, %v408_v37, -inf }
 0x16d   : > { %v414_v41 = vmax.f32 %v413_v33, %v412_v40  ;;  %v430_v42 = vsel %vm409_vm8, %v426_v38, 0.0 }
 0x16e   : > { %v431_v43 = vadd.f32 %v430_v42, %v429_v35 }
 0x16f   : > { %v415_v44 = vrot.slane %v414_v41, 4 }
 0x170   : > { %v432_v45 = vrot.slane %v431_v43, 4 }
 0x171   : > { %v416_v46 = vmax.f32 %v414_v41, %v415_v44 }
 0x172   : > { %v433_v47 = vadd.f32 %v432_v45, %v431_v43 }
 0x173   : > { %v417_v48 = vrot.slane %v416_v46, 2 }
 0x174   : > { %v434_v49 = vrot.slane %v433_v47, 2 }
 0x175   : > { %v418_v50 = vmax.f32 %v416_v46, %v417_v48 }
 0x176   : > { %v435_v51 = vadd.f32 %v434_v49, %v433_v47 }
 0x177   : > { %v419_v52 = vrot.slane %v418_v50, 1 }
 0x178   : > { %v436_v53 = vrot.slane %v435_v51, 1 }
 0x179   : > { %v420_v55 = vmax.f32 %v418_v50, %v419_v52 }
 0x17a   : > { %v437_v54 = vadd.f32 %v436_v53, %v435_v51 }
 0x17c   : > { %v438_v56 = vmul.f32 0.041666668, %v437_v54 }
 0x17e   : > { %v439_v57 = vsub.f32 %v420_v55, %v438_v56 }
 0x180   : > { %441 = vst.msk [vmem:[%s281_s5] sm:$0x1] %vm440_vm10, %v439_v57 }
 0x181   : > { %841 = shalt.err (!%p838_p8)
}
 0x182   : > { %s842_s17 = scalar_lea.hbm %s1224_s8, 16  ;;  %s846_s10 = scalar_lea.hbm %s1281_s3, 128 }
 0x183   : > { %p843_p10 = scmp.ne.s32.totalorder %s1224_s8, %s842_s17  ;;  %p847_p11 = scmp.lt.u32.totalorder %s1224_s8, %s1281_s3 }
 0x184   : > { %p848_p3 = scmp.lt.u32.totalorder %s846_s10, %s842_s17  ;;  %p850_p4 = scmp.lt.u32.totalorder %s842_s17, %s1224_s8 }
 0x185   : > { %p844_p13 = pnand %p843_p10, %p1318_p5 }
 0x186   : > { %p849_p2 = por %p848_p3, %p847_p11 }
 0x187   : > { %p845_p7 = pneg %p844_p13 }
 0x188   : > { %p851_p1 = por %p850_p4, %p849_p2 }
 0x18a   : > { %p852_p12 = pnand %p851_p1, %p845_p7 }
 0x18c   : > { %855 = shalt.err (!%p852_p12)
}
 0x18d   : > { %646 = dma.vmem_to_hbm [thread:$0]  (%p1318_p5), %s1226_s25, 16, %s1224_s8, %s443_s15  }
 0x18e PF: > { %p666_p0 = scmp.ge.s32.totalorder %s930_s19, 2  ;;  %s470_s29 = sand.u32 1, %s902_s12  }
 0x18f   : > { %p1319_p9 = scmp.ne.s32.totalorder %s1306_s22, 0  ;;  %s471_s4 = scalar_lea.sflag [#allocation4], %s470_s29 }
 0x191   : > { %p660_p6 = pnand %p666_p0, %p1319_p9 }
 0x193   : > { %897 = dma.done.wait (!%p660_p6), %s471_s4, 16  }
 0x194   : > { %899 = vsyncadd (!%p660_p6), %s471_s4, 4294967280  ;;  %s20_s19 = sadd.s32 1, %s930_s19   ;;  %s1320_s6 = sld [smem:[#allocation16_spill]] }
 0x195   : > { %p17_p8 = scmp.ge.s32.totalorder %s20_s19, 10   ;;  %s1321_s15 = sld [smem:[#allocation12_spill]] }
 0x196   : > { %s1322_s16 = sld [smem:[#allocation13_spill]]  ;;  %s1323_s17 = sld [smem:[#allocation14_spill]] }
 0x197   : > { %s1324_s18 = sld [smem:[#allocation15_spill]]  ;;  %s1325_s12 = smov %s906_s13 }
 0x198   : > { %s1326_s13 = smov %s910_s14  ;;  %19 = sbr.rel (!%p17_p8) target bundleno = 10 (0xa), region = 94 }
 0x19a   : > { %s1327_s14 = smov %s1320_s6 }
 0x19f   :  { %475 = vsyncpa [#allocation3], 1 }
 0x1a0   :  { %477 = vsyncpa [#allocation3 + $0x1], 1 }
 0x1a1   :  { %478 = vsyncpa [#allocation6], 1 }
 0x1a2   :  { %480 = vsyncpa [#allocation6 + $0x1], 1 }
 0x1a3   :  { %481 = vsyncpa [#allocation4], 1 }
 0x1a4   :  { %483 = vsyncpa [#allocation4 + $0x1], 1 }

</bundles_post_ra>
